<compile_context>
chip_gen: v7x
topology: tpu7x:2x2x1
jax: 0.10.0
libtpu: 0.0.40
codegen_flags: <defaults>
</compile_context>

<pallas_src>
import math

import jax
import jax.numpy as jnp
from jax.experimental import pallas as pl
from jax.experimental.pallas import tpu as pltpu

OUTPUT_DIM = 128          # self.output_dim in the module
EDL_COEFF = 0.01          # evidential_regression_loss(coeff=0.01)
EPS = 1e-6                # numerical floor for v / 2*beta*(1+v)
LOG_PI = math.log(math.pi)
LOG_2PI = math.log(2.0 * math.pi)

# ----------------------------------------------------------------------------
# in-kernel math helpers (VPU / EUP friendly)
# ----------------------------------------------------------------------------
_LANCZOS_G = 7.0
_LANCZOS_COEF = (
    0.99999999999980993,
    676.5203681218851,
    -1259.1392167224028,
    771.32342877765313,
    -176.61502916214059,
    12.507343278686905,
    -0.13857109526572012,
    9.9843695780195716e-6,
    1.5056327351493116e-7,
)


def _recip(x):
    # EUP approx vrcp + one Newton step: much cheaper than a full f32 divide,
    # relative error ~1e-7 (keeps the Lanczos cancellation under control).
    r = pl.reciprocal(x, approx=True)
    return r * (2.0 - x * r)


def _lgamma(z):
    """Lanczos log-gamma, valid for z > 0.5 (here z = alpha >= 1)."""
    zm1 = z - 1.0
    x = jnp.full_like(z, _LANCZOS_COEF[0])
    for i in range(1, 9):
        x = x + _LANCZOS_COEF[i] * _recip(zm1 + float(i))
    t = zm1 + _LANCZOS_G + 0.5
    return 0.5 * LOG_2PI + (zm1 + 0.5) * jnp.log(t) - t + jnp.log(x)


def _softplus(x):
    # numerically stable softplus(x) = log(1 + exp(x))
    return jnp.maximum(x, 0.0) + jnp.log(1.0 + jnp.exp(-jnp.abs(x)))


# ----------------------------------------------------------------------------
# Pallas kernel: folded projection+head matmul, NIG head, evidential loss
# ----------------------------------------------------------------------------
def _make_kernel(true_b, tb, needs_mask):
    inv_b = 1.0 / float(true_b)

    def kernel(q_ref, a_ref, wqe_ref, wae_ref, bedl_ref, y_ref, loss_ref):
        step = pl.program_id(0)

        @pl.when(step == 0)
        def _():
            loss_ref[0, 0] = 0.0

        # Folded weight chain: exactly project_q/project_a followed by the
        # DenseNormalGamma dense layer (fold done in f32 on the host).
        edl = (jnp.dot(q_ref[...], wqe_ref[...],
                       preferred_element_type=jnp.float32)
               + jnp.dot(a_ref[...], wae_ref[...],
                         preferred_element_type=jnp.float32)
               + bedl_ref[...])                               # [TB, 4]

        # One softplus over all 4 columns (same vreg lanes), then slice.
        sp = _softplus(edl)
        mu = edl[:, 0:1]                                      # gamma
        v = sp[:, 1:2] + EPS                                  # nu
        alpha = sp[:, 2:3] + 1.0
        beta = sp[:, 3:4]

        # One lane-stacked Lanczos evaluation for lgamma(a) - lgamma(a+0.5).
        lg = _lgamma(jnp.concatenate([alpha, alpha + 0.5], axis=-1))  # [TB,2]
        lg_diff = lg[:, 0:1] - lg[:, 1:2]

        # evidential_regression_loss = mean(NIG NLL) + coeff * mean(NIG reg)
        y = y_ref[...]                                        # [TB, 1]
        err = y - mu
        two_b_lambda = 2.0 * beta * (1.0 + v) + EPS
        nll = (0.5 * (LOG_PI - jnp.log(v))
               - alpha * jnp.log(two_b_lambda)
               + (alpha + 0.5) * jnp.log(v * err * err + two_b_lambda)
               + lg_diff)
        reg = jnp.abs(err) * (2.0 * v + alpha)
        per_row = nll + EDL_COEFF * reg                       # [TB, 1]

        if needs_mask:
            # Mask batch-padding rows (batch padded to a multiple of TB).
            row = step * tb + jax.lax.broadcasted_iota(jnp.int32, (tb, 1), 0)
            per_row = jnp.where(row < true_b, per_row, 0.0)

        partial = jnp.sum(per_row)

        # Accumulate scalar in SMEM (single sst; no lane-sparse VMEM output).
        loss_ref[0, 0] = loss_ref[0, 0] + partial

        @pl.when(step == pl.num_programs(0) - 1)
        def _():
            loss_ref[0, 0] = loss_ref[0, 0] * inv_b

    return kernel


def _round_up(x, m):
    return ((x + m - 1) // m) * m


def retrieval_qa_forward(q_reps, a_reps, wq, wa, wedl, bedl, target, *, tb=512):
    """Fused projections + DenseNormalGamma + evidential loss. Returns scalar."""
    b, dim = q_reps.shape

    # Host-side weight fold: block_diag(wq, wa) @ wedl -> two [dim, 4] mats.
    wqe = jnp.dot(wq, wedl[:OUTPUT_DIM, :]).astype(jnp.float32)
    wae = jnp.dot(wa, wedl[OUTPUT_DIM:, :]).astype(jnp.float32)
    bedl2 = jnp.reshape(bedl, (1, 4)).astype(jnp.float32)

    # Batch tiling: TB rows per grid step (multiple of 8 sublanes), pad batch.
    tb = min(tb, _round_up(b, 8))
    b_pad = _round_up(b, tb)
    if b_pad != b:
        pad = ((0, b_pad - b), (0, 0))
        q_reps = jnp.pad(q_reps, pad)
        a_reps = jnp.pad(a_reps, pad)
        target = jnp.pad(target, pad)

    grid = (b_pad // tb,)
    kernel = _make_kernel(b, tb, needs_mask=(b_pad != b))

    loss = pl.pallas_call(
        kernel,
        out_shape=jax.ShapeDtypeStruct((1, 1), jnp.float32),
        grid=grid,
        in_specs=[
            pl.BlockSpec((tb, dim), lambda i: (i, 0)),   # q_reps tile
            pl.BlockSpec((tb, dim), lambda i: (i, 0)),   # a_reps tile
            pl.BlockSpec((dim, 4), lambda i: (0, 0)),    # folded W (q path)
            pl.BlockSpec((dim, 4), lambda i: (0, 0)),    # folded W (a path)
            pl.BlockSpec((1, 4), lambda i: (0, 0)),      # edl bias
            pl.BlockSpec((tb, 1), lambda i: (i, 0)),     # target tile
        ],
        out_specs=pl.BlockSpec(memory_space=pltpu.MemorySpace.SMEM),
        compiler_params=pltpu.CompilerParams(
            # Batch axis accumulates into one SMEM scalar -> "arbitrary".
            dimension_semantics=("arbitrary",),
            vmem_limit_bytes=32 * 1024 * 1024,
        ),
    )(q_reps, a_reps, wqe, wae, bedl2, target)
    return loss[0, 0]


# ----------------------------------------------------------------------------
# plain-JAX glue: surrogate sentence encoder (stand-in for BERT pooled output)
# ----------------------------------------------------------------------------
def surrogate_sent_encoder(ids, mask, emb_table, w_pool, b_pool):
    # TODO(synk): the real sent_encoder is an external pretrained transformer;
    # a deterministic embedding + masked-mean + tanh pooler stands in for
    # sent_encoder(input_ids, attention_mask=mask)[1].
    x = emb_table[ids]                                        # [B, S, dim]
    m = mask[..., None].astype(x.dtype)
    pooled = (x * m).sum(axis=1) / jnp.maximum(m.sum(axis=1), 1.0)
    return jnp.tanh(pooled @ w_pool + b_pool)                 # [B, dim]


# ----------------------------------------------------------------------------
# pure-JAX reference of the module's math (un-folded, exact lgamma)
# ----------------------------------------------------------------------------
def reference_loss(q_reps, a_reps, wq, wa, wedl, bedl, target):
    q_proj = q_reps @ wq
    a_proj = a_reps @ wa
    edl = jnp.concatenate([q_proj, a_proj], axis=-1) @ wedl + bedl.reshape(1, 4)
    mu = edl[:, 0:1]
    v = jax.nn.softplus(edl[:, 1:2]) + EPS
    alpha = jax.nn.softplus(edl[:, 2:3]) + 1.0
    beta = jax.nn.softplus(edl[:, 3:4])
    err = target - mu
    two_b_lambda = 2.0 * beta * (1.0 + v) + EPS
    nll = (0.5 * jnp.log(jnp.pi / v)
           - alpha * jnp.log(two_b_lambda)
           + (alpha + 0.5) * jnp.log(v * err * err + two_b_lambda)
           + jax.lax.lgamma(alpha) - jax.lax.lgamma(alpha + 0.5))
    reg = jnp.abs(err) * (2.0 * v + alpha)
    return jnp.mean(nll) + EDL_COEFF * jnp.mean(reg)


if __name__ == "__main__":
    B, S, VOCAB, DIM = 8, 16, 64, 32
    key = jax.random.PRNGKey(0)
    ks = jax.random.split(key, 10)

    # forward() inputs
    q_ids = jax.random.randint(ks[0], (B, S), 0, VOCAB)
    a_ids = jax.random.randint(ks[1], (B, S), 0, VOCAB)
    q_mask = jnp.ones((B, S), jnp.float32)
    a_mask = jnp.ones((B, S), jnp.float32)
    target = jax.random.normal(ks[2], (B, 1), jnp.float32)

    # surrogate encoder parameters
    emb_table = 0.1 * jax.random.normal(ks[3], (VOCAB, DIM), jnp.float32)
    w_pool = 0.1 * jax.random.normal(ks[4], (DIM, DIM), jnp.float32)
    b_pool = jnp.zeros((DIM,), jnp.float32)

    # module parameters (Linear weights stored as [in, out])
    wq = (1.0 / math.sqrt(DIM)) * jax.random.normal(
        ks[5], (DIM, OUTPUT_DIM), jnp.float32)                # project_q
    wa = (1.0 / math.sqrt(DIM)) * jax.random.normal(
        ks[6], (DIM, OUTPUT_DIM), jnp.float32)                # project_a
    wedl = (1.0 / math.sqrt(2 * OUTPUT_DIM)) * jax.random.normal(
        ks[7], (2 * OUTPUT_DIM, 4), jnp.float32)              # DenseNormalGamma(256, 1)
    bedl = 0.01 * jax.random.normal(ks[8], (4,), jnp.float32)

    # encoder (glue) -> pooled reps [B, DIM]
    q_reps = surrogate_sent_encoder(q_ids, q_mask, emb_table, w_pool, b_pool)
    a_reps = surrogate_sent_encoder(a_ids, a_mask, emb_table, w_pool, b_pool)

    loss = retrieval_qa_forward(q_reps, a_reps, wq, wa, wedl, bedl, target)
    jax.block_until_ready(loss)

    ref = reference_loss(q_reps, a_reps, wq, wa, wedl, bedl, target)
    assert loss.shape == () and bool(jnp.isfinite(loss))
    assert abs(float(loss) - float(ref)) < 5e-3 + 5e-3 * abs(float(ref))
    print("KERNEL_OK")
</pallas_src>

<mosaic_0001>
module attributes {stable_mosaic.version = 11 : i64} {
  func.func @kernel(%arg0: i32, %arg1: memref<8x32xf32, #tpu.memory_space<vmem>>, %arg2: memref<8x32xf32, #tpu.memory_space<vmem>>, %arg3: memref<32x4xf32, #tpu.memory_space<vmem>>, %arg4: memref<32x4xf32, #tpu.memory_space<vmem>>, %arg5: memref<1x4xf32, #tpu.memory_space<vmem>>, %arg6: memref<8x1xf32, #tpu.memory_space<vmem>>, %arg7: memref<1x1xf32, #tpu.memory_space<smem>>) attributes {dimension_semantics = [#tpu.dimension_semantics<arbitrary>], iteration_bounds = array<i64: 1>, scalar_prefetch = 0 : i64, scratch_operands = 0 : i64, tpu.core_type = #tpu.core_type<tc>, window_params = [{transform_indices = @transform_0, window_bounds = array<i64: 8, 32>}, {transform_indices = @transform_1, window_bounds = array<i64: 8, 32>}, {pipeline_mode = #tpu.pipeline_mode<synchronous>, transform_indices = @transform_2, window_bounds = array<i64: 32, 4>}, {pipeline_mode = #tpu.pipeline_mode<synchronous>, transform_indices = @transform_3, window_bounds = array<i64: 32, 4>}, {pipeline_mode = #tpu.pipeline_mode<synchronous>, transform_indices = @transform_4, window_bounds = array<i64: 1, 4>}, {transform_indices = @transform_5, window_bounds = array<i64: 8, 1>}, {transform_indices = @transform_6, window_bounds = array<i64: 1, 1>}]} {
    %c0_i32 = arith.constant 0 : i32
    %0 = arith.cmpi eq, %arg0, %c0_i32 : i32
    %1 = arith.extui %0 : i1 to i32
    %c0_i32_0 = arith.constant 0 : i32
    %2 = arith.cmpi ne, %1, %c0_i32_0 : i32
    scf.if %2 {
      %cst_64 = arith.constant 0.000000e+00 : f32
      %c0_65 = arith.constant 0 : index
      %c0_66 = arith.constant 0 : index
      %177 = memref.load %arg7[%c0_65, %c0_66] : memref<1x1xf32, #tpu.memory_space<smem>>
      memref.store %cst_64, %arg7[%c0_65, %c0_66] : memref<1x1xf32, #tpu.memory_space<smem>>
    } else {
    }
    %c0 = arith.constant 0 : index
    %c0_1 = arith.constant 0 : index
    %3 = vector.load %arg1[%c0, %c0_1] : memref<8x32xf32, #tpu.memory_space<vmem>>, vector<8x32xf32>
    %c0_2 = arith.constant 0 : index
    %c0_3 = arith.constant 0 : index
    %4 = vector.load %arg3[%c0_2, %c0_3] : memref<32x4xf32, #tpu.memory_space<vmem>>, vector<32x4xf32>
    %cst = arith.constant dense<0.000000e+00> : vector<8x4xf32>
    %5 = tpu.matmul %3, %4, %cst {dimension_numbers = #tpu.dot_dimension_numbers<[1], [0], [0], [1], [0, 0, 1, 1], [], []>} : vector<8x32xf32>, vector<32x4xf32>, vector<8x4xf32> -> vector<8x4xf32>
    %c0_4 = arith.constant 0 : index
    %c0_5 = arith.constant 0 : index
    %6 = vector.load %arg2[%c0_4, %c0_5] : memref<8x32xf32, #tpu.memory_space<vmem>>, vector<8x32xf32>
    %c0_6 = arith.constant 0 : index
    %c0_7 = arith.constant 0 : index
    %7 = vector.load %arg4[%c0_6, %c0_7] : memref<32x4xf32, #tpu.memory_space<vmem>>, vector<32x4xf32>
    %cst_8 = arith.constant dense<0.000000e+00> : vector<8x4xf32>
    %8 = tpu.matmul %6, %7, %cst_8 {dimension_numbers = #tpu.dot_dimension_numbers<[1], [0], [0], [1], [0, 0, 1, 1], [], []>} : vector<8x32xf32>, vector<32x4xf32>, vector<8x4xf32> -> vector<8x4xf32>
    %9 = arith.addf %5, %8 : vector<8x4xf32>
    %c0_9 = arith.constant 0 : index
    %c0_10 = arith.constant 0 : index
    %10 = vector.load %arg5[%c0_9, %c0_10] : memref<1x4xf32, #tpu.memory_space<vmem>>, vector<1x4xf32>
    %11 = vector.broadcast %10 : vector<1x4xf32> to vector<8x4xf32>
    %12 = arith.addf %9, %11 : vector<8x4xf32>
    %cst_11 = arith.constant 0.000000e+00 : f32
    %13 = vector.broadcast %cst_11 : f32 to vector<8x4xf32>
    %14 = arith.maximumf %12, %13 : vector<8x4xf32>
    %15 = math.absf %12 : vector<8x4xf32>
    %cst_12 = arith.constant 0.000000e+00 : f32
    %16 = vector.broadcast %cst_12 : f32 to vector<8x4xf32>
    %17 = arith.subf %16, %15 : vector<8x4xf32>
    %18 = math.exp %17 : vector<8x4xf32>
    %cst_13 = arith.constant 1.000000e+00 : f32
    %19 = vector.broadcast %cst_13 : f32 to vector<8x4xf32>
    %20 = arith.addf %19, %18 : vector<8x4xf32>
    %21 = math.log %20 : vector<8x4xf32>
    %22 = arith.addf %14, %21 : vector<8x4xf32>
    %23 = vector.extract_strided_slice %12 {offsets = [0, 0], sizes = [8, 1], strides = [1, 1]} : vector<8x4xf32> to vector<8x1xf32>
    %24 = vector.extract_strided_slice %22 {offsets = [0, 1], sizes = [8, 1], strides = [1, 1]} : vector<8x4xf32> to vector<8x1xf32>
    %cst_14 = arith.constant 9.99999997E-7 : f32
    %25 = vector.broadcast %cst_14 : f32 to vector<8x1xf32>
    %26 = arith.addf %24, %25 : vector<8x1xf32>
    %27 = vector.extract_strided_slice %22 {offsets = [0, 2], sizes = [8, 1], strides = [1, 1]} : vector<8x4xf32> to vector<8x1xf32>
    %cst_15 = arith.constant 1.000000e+00 : f32
    %28 = vector.broadcast %cst_15 : f32 to vector<8x1xf32>
    %29 = arith.addf %27, %28 : vector<8x1xf32>
    %30 = vector.extract_strided_slice %22 {offsets = [0, 3], sizes = [8, 1], strides = [1, 1]} : vector<8x4xf32> to vector<8x1xf32>
    %cst_16 = arith.constant 5.000000e-01 : f32
    %31 = vector.broadcast %cst_16 : f32 to vector<8x1xf32>
    %32 = arith.addf %29, %31 : vector<8x1xf32>
    %33 = tpu.concatenate %29, %32 in 1 : vector<8x1xf32>, vector<8x1xf32> -> vector<8x2xf32>
    %cst_17 = arith.constant 1.000000e+00 : f32
    %34 = vector.broadcast %cst_17 : f32 to vector<8x2xf32>
    %35 = arith.subf %33, %34 : vector<8x2xf32>
    %cst_18 = arith.constant 1.000000e+00 : f32
    %36 = vector.broadcast %cst_18 : f32 to vector<8x2xf32>
    %cst_19 = arith.constant 1.000000e+00 : f32
    %37 = vector.broadcast %cst_19 : f32 to vector<8x2xf32>
    %38 = arith.addf %35, %37 : vector<8x2xf32>
    %39 = tpu.reciprocal %38 {approx = true} : vector<8x2xf32> -> vector<8x2xf32>
    %40 = arith.mulf %38, %39 : vector<8x2xf32>
    %cst_20 = arith.constant 2.000000e+00 : f32
    %41 = vector.broadcast %cst_20 : f32 to vector<8x2xf32>
    %42 = arith.subf %41, %40 : vector<8x2xf32>
    %43 = arith.mulf %39, %42 : vector<8x2xf32>
    %cst_21 = arith.constant 676.520386 : f32
    %44 = vector.broadcast %cst_21 : f32 to vector<8x2xf32>
    %45 = arith.mulf %44, %43 : vector<8x2xf32>
    %46 = arith.addf %36, %45 : vector<8x2xf32>
    %cst_22 = arith.constant 2.000000e+00 : f32
    %47 = vector.broadcast %cst_22 : f32 to vector<8x2xf32>
    %48 = arith.addf %35, %47 : vector<8x2xf32>
    %49 = tpu.reciprocal %48 {approx = true} : vector<8x2xf32> -> vector<8x2xf32>
    %50 = arith.mulf %48, %49 : vector<8x2xf32>
    %cst_23 = arith.constant 2.000000e+00 : f32
    %51 = vector.broadcast %cst_23 : f32 to vector<8x2xf32>
    %52 = arith.subf %51, %50 : vector<8x2xf32>
    %53 = arith.mulf %49, %52 : vector<8x2xf32>
    %cst_24 = arith.constant -1259.13916 : f32
    %54 = vector.broadcast %cst_24 : f32 to vector<8x2xf32>
    %55 = arith.mulf %54, %53 : vector<8x2xf32>
    %56 = arith.addf %46, %55 : vector<8x2xf32>
    %cst_25 = arith.constant 3.000000e+00 : f32
    %57 = vector.broadcast %cst_25 : f32 to vector<8x2xf32>
    %58 = arith.addf %35, %57 : vector<8x2xf32>
    %59 = tpu.reciprocal %58 {approx = true} : vector<8x2xf32> -> vector<8x2xf32>
    %60 = arith.mulf %58, %59 : vector<8x2xf32>
    %cst_26 = arith.constant 2.000000e+00 : f32
    %61 = vector.broadcast %cst_26 : f32 to vector<8x2xf32>
    %62 = arith.subf %61, %60 : vector<8x2xf32>
    %63 = arith.mulf %59, %62 : vector<8x2xf32>
    %cst_27 = arith.constant 771.323425 : f32
    %64 = vector.broadcast %cst_27 : f32 to vector<8x2xf32>
    %65 = arith.mulf %64, %63 : vector<8x2xf32>
    %66 = arith.addf %56, %65 : vector<8x2xf32>
    %cst_28 = arith.constant 4.000000e+00 : f32
    %67 = vector.broadcast %cst_28 : f32 to vector<8x2xf32>
    %68 = arith.addf %35, %67 : vector<8x2xf32>
    %69 = tpu.reciprocal %68 {approx = true} : vector<8x2xf32> -> vector<8x2xf32>
    %70 = arith.mulf %68, %69 : vector<8x2xf32>
    %cst_29 = arith.constant 2.000000e+00 : f32
    %71 = vector.broadcast %cst_29 : f32 to vector<8x2xf32>
    %72 = arith.subf %71, %70 : vector<8x2xf32>
    %73 = arith.mulf %69, %72 : vector<8x2xf32>
    %cst_30 = arith.constant -176.615036 : f32
    %74 = vector.broadcast %cst_30 : f32 to vector<8x2xf32>
    %75 = arith.mulf %74, %73 : vector<8x2xf32>
    %76 = arith.addf %66, %75 : vector<8x2xf32>
    %cst_31 = arith.constant 5.000000e+00 : f32
    %77 = vector.broadcast %cst_31 : f32 to vector<8x2xf32>
    %78 = arith.addf %35, %77 : vector<8x2xf32>
    %79 = tpu.reciprocal %78 {approx = true} : vector<8x2xf32> -> vector<8x2xf32>
    %80 = arith.mulf %78, %79 : vector<8x2xf32>
    %cst_32 = arith.constant 2.000000e+00 : f32
    %81 = vector.broadcast %cst_32 : f32 to vector<8x2xf32>
    %82 = arith.subf %81, %80 : vector<8x2xf32>
    %83 = arith.mulf %79, %82 : vector<8x2xf32>
    %cst_33 = arith.constant 12.5073433 : f32
    %84 = vector.broadcast %cst_33 : f32 to vector<8x2xf32>
    %85 = arith.mulf %84, %83 : vector<8x2xf32>
    %86 = arith.addf %76, %85 : vector<8x2xf32>
    %cst_34 = arith.constant 6.000000e+00 : f32
    %87 = vector.broadcast %cst_34 : f32 to vector<8x2xf32>
    %88 = arith.addf %35, %87 : vector<8x2xf32>
    %89 = tpu.reciprocal %88 {approx = true} : vector<8x2xf32> -> vector<8x2xf32>
    %90 = arith.mulf %88, %89 : vector<8x2xf32>
    %cst_35 = arith.constant 2.000000e+00 : f32
    %91 = vector.broadcast %cst_35 : f32 to vector<8x2xf32>
    %92 = arith.subf %91, %90 : vector<8x2xf32>
    %93 = arith.mulf %89, %92 : vector<8x2xf32>
    %cst_36 = arith.constant -0.138571098 : f32
    %94 = vector.broadcast %cst_36 : f32 to vector<8x2xf32>
    %95 = arith.mulf %94, %93 : vector<8x2xf32>
    %96 = arith.addf %86, %95 : vector<8x2xf32>
    %cst_37 = arith.constant 7.000000e+00 : f32
    %97 = vector.broadcast %cst_37 : f32 to vector<8x2xf32>
    %98 = arith.addf %35, %97 : vector<8x2xf32>
    %99 = tpu.reciprocal %98 {approx = true} : vector<8x2xf32> -> vector<8x2xf32>
    %100 = arith.mulf %98, %99 : vector<8x2xf32>
    %cst_38 = arith.constant 2.000000e+00 : f32
    %101 = vector.broadcast %cst_38 : f32 to vector<8x2xf32>
    %102 = arith.subf %101, %100 : vector<8x2xf32>
    %103 = arith.mulf %99, %102 : vector<8x2xf32>
    %cst_39 = arith.constant 9.98436917E-6 : f32
    %104 = vector.broadcast %cst_39 : f32 to vector<8x2xf32>
    %105 = arith.mulf %104, %103 : vector<8x2xf32>
    %106 = arith.addf %96, %105 : vector<8x2xf32>
    %cst_40 = arith.constant 8.000000e+00 : f32
    %107 = vector.broadcast %cst_40 : f32 to vector<8x2xf32>
    %108 = arith.addf %35, %107 : vector<8x2xf32>
    %109 = tpu.reciprocal %108 {approx = true} : vector<8x2xf32> -> vector<8x2xf32>
    %110 = arith.mulf %108, %109 : vector<8x2xf32>
    %cst_41 = arith.constant 2.000000e+00 : f32
    %111 = vector.broadcast %cst_41 : f32 to vector<8x2xf32>
    %112 = arith.subf %111, %110 : vector<8x2xf32>
    %113 = arith.mulf %109, %112 : vector<8x2xf32>
    %cst_42 = arith.constant 1.50563267E-7 : f32
    %114 = vector.broadcast %cst_42 : f32 to vector<8x2xf32>
    %115 = arith.mulf %114, %113 : vector<8x2xf32>
    %116 = arith.addf %106, %115 : vector<8x2xf32>
    %cst_43 = arith.constant 7.000000e+00 : f32
    %117 = vector.broadcast %cst_43 : f32 to vector<8x2xf32>
    %118 = arith.addf %35, %117 : vector<8x2xf32>
    %cst_44 = arith.constant 5.000000e-01 : f32
    %119 = vector.broadcast %cst_44 : f32 to vector<8x2xf32>
    %120 = arith.addf %118, %119 : vector<8x2xf32>
    %cst_45 = arith.constant 5.000000e-01 : f32
    %121 = vector.broadcast %cst_45 : f32 to vector<8x2xf32>
    %122 = arith.addf %35, %121 : vector<8x2xf32>
    %123 = math.log %120 : vector<8x2xf32>
    %124 = arith.mulf %122, %123 : vector<8x2xf32>
    %cst_46 = arith.constant 0.918938517 : f32
    %125 = vector.broadcast %cst_46 : f32 to vector<8x2xf32>
    %126 = arith.addf %125, %124 : vector<8x2xf32>
    %127 = arith.subf %126, %120 : vector<8x2xf32>
    %128 = math.log %116 : vector<8x2xf32>
    %129 = arith.addf %127, %128 : vector<8x2xf32>
    %130 = vector.extract_strided_slice %129 {offsets = [0, 0], sizes = [8, 1], strides = [1, 1]} : vector<8x2xf32> to vector<8x1xf32>
    %131 = vector.extract_strided_slice %129 {offsets = [0, 1], sizes = [8, 1], strides = [1, 1]} : vector<8x2xf32> to vector<8x1xf32>
    %132 = arith.subf %130, %131 : vector<8x1xf32>
    %c0_47 = arith.constant 0 : index
    %c0_48 = arith.constant 0 : index
    %133 = vector.load %arg6[%c0_47, %c0_48] : memref<8x1xf32, #tpu.memory_space<vmem>>, vector<8x1xf32>
    %134 = arith.subf %133, %23 : vector<8x1xf32>
    %cst_49 = arith.constant 2.000000e+00 : f32
    %135 = vector.broadcast %cst_49 : f32 to vector<8x1xf32>
    %136 = arith.mulf %135, %30 : vector<8x1xf32>
    %cst_50 = arith.constant 1.000000e+00 : f32
    %137 = vector.broadcast %cst_50 : f32 to vector<8x1xf32>
    %138 = arith.addf %137, %26 : vector<8x1xf32>
    %139 = arith.mulf %136, %138 : vector<8x1xf32>
    %cst_51 = arith.constant 9.99999997E-7 : f32
    %140 = vector.broadcast %cst_51 : f32 to vector<8x1xf32>
    %141 = arith.addf %139, %140 : vector<8x1xf32>
    %142 = math.log %26 : vector<8x1xf32>
    %cst_52 = arith.constant 1.14472985 : f32
    %143 = vector.broadcast %cst_52 : f32 to vector<8x1xf32>
    %144 = arith.subf %143, %142 : vector<8x1xf32>
    %cst_53 = arith.constant 5.000000e-01 : f32
    %145 = vector.broadcast %cst_53 : f32 to vector<8x1xf32>
    %146 = arith.mulf %145, %144 : vector<8x1xf32>
    %147 = math.log %141 : vector<8x1xf32>
    %148 = arith.mulf %29, %147 : vector<8x1xf32>
    %149 = arith.subf %146, %148 : vector<8x1xf32>
    %cst_54 = arith.constant 5.000000e-01 : f32
    %150 = vector.broadcast %cst_54 : f32 to vector<8x1xf32>
    %151 = arith.addf %29, %150 : vector<8x1xf32>
    %152 = arith.mulf %26, %134 : vector<8x1xf32>
    %153 = arith.mulf %152, %134 : vector<8x1xf32>
    %154 = arith.addf %153, %141 : vector<8x1xf32>
    %155 = math.log %154 : vector<8x1xf32>
    %156 = arith.mulf %151, %155 : vector<8x1xf32>
    %157 = arith.addf %149, %156 : vector<8x1xf32>
    %158 = arith.addf %157, %132 : vector<8x1xf32>
    %159 = math.absf %134 : vector<8x1xf32>
    %cst_55 = arith.constant 2.000000e+00 : f32
    %160 = vector.broadcast %cst_55 : f32 to vector<8x1xf32>
    %161 = arith.mulf %160, %26 : vector<8x1xf32>
    %162 = arith.addf %161, %29 : vector<8x1xf32>
    %163 = arith.mulf %159, %162 : vector<8x1xf32>
    %cst_56 = arith.constant 0.00999999977 : f32
    %164 = vector.broadcast %cst_56 : f32 to vector<8x1xf32>
    %165 = arith.mulf %164, %163 : vector<8x1xf32>
    %166 = arith.addf %158, %165 : vector<8x1xf32>
    %167 = vector.shape_cast %166 : vector<8x1xf32> to vector<1x8x1xf32>
    %cst_57 = arith.constant dense<0.000000e+00> : vector<1xf32>
    %168 = vector.multi_reduction <add>, %167, %cst_57 [1, 2] : vector<1x8x1xf32> to vector<1xf32>
    %169 = vector.shape_cast %168 : vector<1xf32> to vector<1x1x1xf32>
    %170 = vector.extract %169[0, 0, 0] : f32 from vector<1x1x1xf32>
    %c0_58 = arith.constant 0 : index
    %c0_59 = arith.constant 0 : index
    %171 = memref.load %arg7[%c0_58, %c0_59] : memref<1x1xf32, #tpu.memory_space<smem>>
    %172 = arith.addf %171, %170 : f32
    %c0_60 = arith.constant 0 : index
    %c0_61 = arith.constant 0 : index
    %173 = memref.load %arg7[%c0_60, %c0_61] : memref<1x1xf32, #tpu.memory_space<smem>>
    memref.store %172, %arg7[%c0_60, %c0_61] : memref<1x1xf32, #tpu.memory_space<smem>>
    %c0_i32_62 = arith.constant 0 : i32
    %174 = arith.cmpi eq, %arg0, %c0_i32_62 : i32
    %175 = arith.extui %174 : i1 to i32
    %c0_i32_63 = arith.constant 0 : i32
    %176 = arith.cmpi ne, %175, %c0_i32_63 : i32
    scf.if %176 {
      %c0_64 = arith.constant 0 : index
      %c0_65 = arith.constant 0 : index
      %177 = memref.load %arg7[%c0_64, %c0_65] : memref<1x1xf32, #tpu.memory_space<smem>>
      %cst_66 = arith.constant 1.250000e-01 : f32
      %178 = arith.mulf %177, %cst_66 : f32
      %c0_67 = arith.constant 0 : index
      %c0_68 = arith.constant 0 : index
      %179 = memref.load %arg7[%c0_67, %c0_68] : memref<1x1xf32, #tpu.memory_space<smem>>
      memref.store %178, %arg7[%c0_67, %c0_68] : memref<1x1xf32, #tpu.memory_space<smem>>
    } else {
    }
    return
  }
  func.func @transform_0(%arg0: i32) -> (i32, i32) {
    %c0_i32 = arith.constant 0 : i32
    %c0_i32_0 = arith.constant 0 : i32
    return %arg0, %c0_i32 : i32, i32
  }
  func.func @transform_1(%arg0: i32) -> (i32, i32) {
    %c0_i32 = arith.constant 0 : i32
    %c0_i32_0 = arith.constant 0 : i32
    return %arg0, %c0_i32 : i32, i32
  }
  func.func @transform_2(%arg0: i32) -> (i32, i32) {
    %c0_i32 = arith.constant 0 : i32
    %c0_i32_0 = arith.constant 0 : i32
    %c0_i32_1 = arith.constant 0 : i32
    return %c0_i32, %c0_i32_0 : i32, i32
  }
  func.func @transform_3(%arg0: i32) -> (i32, i32) {
    %c0_i32 = arith.constant 0 : i32
    %c0_i32_0 = arith.constant 0 : i32
    %c0_i32_1 = arith.constant 0 : i32
    return %c0_i32, %c0_i32_0 : i32, i32
  }
  func.func @transform_4(%arg0: i32) -> (i32, i32) {
    %c0_i32 = arith.constant 0 : i32
    %c0_i32_0 = arith.constant 0 : i32
    %c0_i32_1 = arith.constant 0 : i32
    return %c0_i32, %c0_i32_0 : i32, i32
  }
  func.func @transform_5(%arg0: i32) -> (i32, i32) {
    %c0_i32 = arith.constant 0 : i32
    %c0_i32_0 = arith.constant 0 : i32
    return %arg0, %c0_i32 : i32, i32
  }
  func.func @transform_6(%arg0: i32) -> (i32, i32) {
    %c0_i32 = arith.constant 0 : i32
    %c0_i32_0 = arith.constant 0 : i32
    %c0_i32_1 = arith.constant 0 : i32
    return %c0_i32, %c0_i32_0 : i32, i32
  }
}

</mosaic_0001>

<bundles_post_ra>
// kernel: tpu_custom_call.1
= control target key start
LH: loop header
LB: loop body
LE: loop exit
PB: predicated region body
PF: predicated region fallthrough
CT: control target
= control target key end

     0   :  { %v498_v3 = vmov 0.0|0.0   ;;  %vm499_vm0 = vmmov 0   ;;  %v500_v11 = vmov 0.0   ;;  %s634_s0 = inlined_call_operand.vmem [shape: f32[8,32], index: 0, kind: input, shape index: {}]   ;;  %s635_s1 = inlined_call_operand.vmem [shape: f32[8,32], index: 1, kind: input, shape index: {}]   ;;  %s636_s2 = inlined_call_operand.vmem [shape: f32[32,4], index: 2, kind: input, shape index: {}]   ;;  %s637_s3 = inlined_call_operand.vmem [shape: f32[32,4], index: 3, kind: input, shape index: {}]   ;;  %s638_s4 = inlined_call_operand.vmem [shape: f32[1,4], index: 4, kind: input, shape index: {}]   ;;  %s639_s5 = inlined_call_operand.vmem [shape: f32[8,1], index: 5, kind: input, shape index: {}]   ;;  %s640_s6 = inlined_call_operand.hbm [shape: f32[1,1], index: 6, kind: output, shape index: {}]  }
   0x1   :  { %v36_v0 = vld [vmem:[%s637_s3] sm:$0xff]  ;;  %v37_v1 = vld [vmem:[%s637_s3 + $0x8] sm:$0xff]  ;;  %433 = vmatprep.subr.bf16.mxu0 %v498_v3  ;;  %439 = vmatprep.subr.bf16.mxu1 %v498_v3  ;;  %v38_v6 = vld [vmem:[%s637_s3 + $0x10] sm:$0xff] }
   0x2   :  { %v31_v2 = vld [vmem:[%s636_s2] sm:$0xff]  ;;  %v434_v4 = vpack.c.bf16 %v37_v1, %v36_v0  ;;  %v32_v5 = vld [vmem:[%s636_s2 + $0x8] sm:$0xff]  ;;  %v39_v7 = vld [vmem:[%s637_s3 + $0x18] sm:$0xff]  ;;  %419 = vmatprep.mubr.msk.f32.mxu0 %vm499_vm0, %v500_v11  ;;  %430 = vmatprep.mubr.msk.f32.mxu1 %vm499_vm0, %v500_v11 }
   0x3   :  { %v440_v8 = vpack.c.bf16 %v32_v5, %v31_v2  ;;  %v33_v9 = vld [vmem:[%s636_s2 + $0x10] sm:$0xff]  ;;  %v34_v10 = vld [vmem:[%s636_s2 + $0x18] sm:$0xff]  ;;  %v437_v12 = vpack.c.bf16 %v39_v7, %v38_v6 }
   0x4   :  { %435 = vmatpush3.bf16.msra.mxu0 %v434_v4 }
   0x5   :  { %11 = vsyncpa [#allocation3], 0  ;;  %441 = vmatpush3.bf16.msra.mxu1 %v440_v8  ;;  %436 = vmatprep.subr.bf16.mxu0 %v498_v3  ;;  %v443_v13 = vpack.c.bf16 %v34_v10, %v33_v9  ;;  %v35_v14 = vld [vmem:[%s635_s1] sm:$0xff]  ;;  %vm40_vm1 = vcmask 261120   ;;  %s502_s17 = smov 2   ;;  %s503_s18 = smov 1  }
   0x6   :  { %442 = vmatprep.subr.bf16.mxu1 %v498_v3  ;;  %v30_v15 = vld [vmem:[%s634_s0] sm:$0xff]  ;;  %s504_s19 = smov 126   ;;  %vm215_vm2 = vcmask 7168   ;;  %s486_s23 = scalar_lea.hbm %s640_s6, 16 }
   0x7   :  { %v399_v18 = vld [vmem:[%s638_s4] ss:$0 sm:$0xff]  ;;  %s501_s4 = smov 127   ;;  %p487_p0 = scmp.ne.s32.totalorder %s640_s6, %s486_s23 }
   0x8   :  { %438 = vmatpush3.bf16.msra.mxu0 %v437_v12  ;;  %v289_v36 = vld [vmem:[%s639_s5] sm:$0xff]  ;;  %p490_p1 = scmp.lt.u32.totalorder %s486_s23, %s640_s6 }
   0x9   :  { %444 = vmatpush3.bf16.msra.mxu1 %v443_v13 }
   0xa   :  { %p492_p2 = pnand %p490_p1, %p487_p0 }
   0xb   :  { %420 = vmatmul.mubr.msk.f32.vlgmr.msra.gmra.mrb[0].mxu0 %vm40_vm1, %v35_v14 }
   0xc   :  { %431 = vmatmul.mubr.msk.f32.vlgmr.msra.gmra.mrb[0].mxu1 %vm40_vm1, %v30_v15 }
  0xde   :  { %v110_v16 = vpop.f32.mrb[0].mxu0 }
  0xdf   :  { %v183_v17 = vpop.f32.mrb[0].mxu1  ;;  %v421_v19 = vpop.f32.mrb[1].mxu0 }
  0xe0   :  { %v184_v20 = vadd.f32 %v183_v17, %v110_v16  ;;  %v432_v21 = vpop.f32.mrb[1].mxu1 }
  0xe2   :  { %v194_v22 = vadd.f32 %v399_v18, %v184_v20 }
  0xe4   :  { %v196_v23 = vand.u32 2147483647, %v194_v22  ;;  %v195_v29 = vmax.f32 %v194_v22, 0.0  ;;  %v587_v37 = vsub.f32 %v289_v36, %v194_v22 }
  0xe6   :  { %v197_v24 = vsub.f32 0.0, %v196_v23 }
  0xe8   :  { %v198_v25 = vmul.f32 1.442695, %v197_v24 }
  0xea   :  { %456 = vpow2.f32 %v198_v25 }
  0xf4   :  { %v457_v26 = vpop.eup %456 }
  0xf5   :  { %v200_v27 = vadd.f32 1.0, %v457_v26 }
  0xf7   :  { %458 = vlog2.f32 %v200_v27 }
 0x101   :  { %v459_v28 = vpop.eup %458 }
 0x102   :  { %v202_v30 = vmul.f32 0.6931472, %v459_v28 }
 0x104   :  { %v203_v31 = vadd.f32 %v202_v30, %v195_v29 }
 0x106   :  { %v574_v32 = vadd.f32 1.0, %v203_v31  ;;  %v576_v33 = vadd.f32 1e-06, %v203_v31  ;;  %v291_v38 = vmul.f32 2.0, %v203_v31 }
 0x108   :  { %v579_v34 = vadd.f32 0.5, %v574_v32  ;;  %v292_v35 = vadd.f32 1.0, %v576_v33 }
 0x10a   :  { %212 = vrot.lane.b32.xlu1 %v579_v34, %s501_s4  ;;  %294 = vrot.lane.b32.xlu0 %v292_v35, %s502_s17 }
 0x10e   :  { %316 = vrot.lane.b32.xlu1 %v587_v37, %s503_s18  ;;  %208 = vrot.lane.b32.xlu0 %v574_v32, %s504_s19 }
 0x112   :  { %345 = vrot.lane.b32.xlu1 %v574_v32, %s501_s4 }
 0x17c   :  { %v295_v39 = vpop.permute.xlu0 %294  ;;  %v213_v42 = vpop.permute.xlu1 %212 }
 0x17d   :  { %v297_v40 = vmul.f32 %v295_v39, %v291_v38 }
 0x17f   :  { %v298_v41 = vadd.f32 1e-06, %v297_v40 }
 0x180   :  { %v209_v43 = vpop.permute.xlu0 %208 }
 0x181   :  { %460 = vlog2.f32 %v298_v41  ;;  %v216_v44 = vsel %vm215_vm2, %v209_v43, %v213_v42  ;;  %322 = vrot.lane.b32.xlu0 %v298_v41, %s504_s19 }
 0x182   :  { %v595_v45 = vadd.f32 -1.0, %v216_v44 }
 0x184   :  { %v218_v46 = vadd.f32 1.0, %v595_v45  ;;  %v225_v47 = vadd.f32 2.0, %v595_v45  ;;  %v232_v48 = vadd.f32 3.0, %v595_v45  ;;  %v239_v49 = vadd.f32 4.0, %v595_v45 }
 0x185   :  { %v246_v50 = vadd.f32 5.0, %v595_v45  ;;  %v253_v51 = vadd.f32 6.0, %v595_v45  ;;  %v260_v52 = vadd.f32 7.0, %v595_v45  ;;  %v267_v53 = vadd.f32 8.0, %v595_v45 }
 0x186   :  { %462 = vrcp.f32 %v218_v46 }
 0x187   :  { %464 = vrcp.f32 %v225_v47  ;;  %v274_v11 = vadd.f32 0.5, %v260_v52 }
 0x188   :  { %466 = vrcp.f32 %v232_v48 }
 0x189   :  { %468 = vrcp.f32 %v239_v49 }
 0x18a   :  { %470 = vrcp.f32 %v246_v50 }
 0x18b   :  { %v461_v54 = vpop.eup %460  ;;  %472 = vrcp.f32 %v253_v51 }
 0x18c   :  { %v304_v55 = vmul.f32 0.6931472, %v461_v54  ;;  %474 = vrcp.f32 %v260_v52 }
 0x18d   :  { %476 = vrcp.f32 %v267_v53 }
 0x18e   :  { %306 = vrot.lane.b32.xlu0 %v304_v55, %s501_s4  ;;  %478 = vlog2.f32 %v274_v11  ;;  %v317_v55 = vpop.permute.xlu1 %316 }
 0x190   :  { %v463_v56 = vpop.eup %462 }
 0x191   :  { %v465_v57 = vpop.eup %464  ;;  %v220_v58 = vmul.f32 %v463_v56, %v218_v46 }
 0x192   :  { %v467_v59 = vpop.eup %466  ;;  %v227_v60 = vmul.f32 %v465_v57, %v225_v47 }
 0x193   :  { %v469_v61 = vpop.eup %468  ;;  %v221_v62 = vsub.f32 2.0, %v220_v58  ;;  %v234_v63 = vmul.f32 %v467_v59, %v232_v48  ;;  %v275_v48 = vadd.f32 0.5, %v595_v45 }
 0x194   :  { %v471_v0 = vpop.eup %470  ;;  %v228_v1 = vsub.f32 2.0, %v227_v60  ;;  %v241_v2 = vmul.f32 %v469_v61, %v239_v49 }
 0x195   :  { %v473_v3 = vpop.eup %472  ;;  %v222_v4 = vmul.f32 %v463_v56, %v221_v62  ;;  %v235_v5 = vsub.f32 2.0, %v234_v63  ;;  %v248_v6 = vmul.f32 %v471_v0, %v246_v50  ;;  %v319_v56 = vmul.f32 %v317_v55, %v576_v33  ;;  %v346_v63 = vpop.permute.xlu1 %345 }
 0x196   :  { %v475_v7 = vpop.eup %474  ;;  %v229_v8 = vmul.f32 %v465_v57, %v228_v1  ;;  %v242_v9 = vsub.f32 2.0, %v241_v2  ;;  %v255_v10 = vmul.f32 %v473_v3, %v253_v51 }
 0x197   :  { %v477_v12 = vpop.eup %476  ;;  %v223_v13 = vmul.f32 676.5204, %v222_v4  ;;  %v236_v14 = vmul.f32 %v467_v59, %v235_v5  ;;  %v249_v15 = vsub.f32 2.0, %v248_v6  ;;  %v262_v16 = vmul.f32 %v475_v7, %v260_v52 }
 0x198   :  { %v230_v17 = vmul.f32 -1259.1392, %v229_v8  ;;  %v243_v19 = vmul.f32 %v469_v61, %v242_v9  ;;  %v256_v20 = vsub.f32 2.0, %v255_v10  ;;  %v269_v21 = vmul.f32 %v477_v12, %v267_v53  ;;  %v479_v42 = vpop.eup %478 }
 0x199   :  { %v224_v18 = vadd.f32 1.0, %v223_v13  ;;  %v237_v23 = vmul.f32 771.3234, %v236_v14  ;;  %v250_v24 = vmul.f32 %v471_v0, %v249_v15  ;;  %v263_v25 = vsub.f32 2.0, %v262_v16 }
 0x19a   :  { %v244_v27 = vmul.f32 -176.61504, %v243_v19  ;;  %v257_v28 = vmul.f32 %v473_v3, %v256_v20  ;;  %v270_v29 = vsub.f32 2.0, %v269_v21  ;;  %v277_v47 = vmul.f32 0.6931472, %v479_v42 }
 0x19b   :  { %v231_v22 = vadd.f32 %v230_v17, %v224_v18  ;;  %v251_v31 = vmul.f32 12.507343, %v250_v24  ;;  %v264_v35 = vmul.f32 %v475_v7, %v263_v25  ;;  %v320_v57 = vmul.f32 %v319_v56, %v317_v55 }
 0x19c   :  { %v258_v38 = vmul.f32 -0.1385711, %v257_v28  ;;  %v271_v39 = vmul.f32 %v477_v12, %v270_v29  ;;  %v278_v49 = vmul.f32 %v277_v47, %v275_v48  ;;  %v344_v0 = vmul.f32 2.0, %v576_v33 }
 0x19d   :  { %v238_v26 = vadd.f32 %v237_v23, %v231_v22  ;;  %v265_v41 = vmul.f32 9.984369e-06, %v264_v35 }
 0x19e   :  { %v272_v44 = vmul.f32 1.5056327e-07, %v271_v39  ;;  %v279_v50 = vadd.f32 0.9189385, %v278_v49  ;;  %v348_v1 = vadd.f32 %v346_v63, %v344_v0 }
 0x19f   :  { %v245_v30 = vadd.f32 %v244_v27, %v238_v26 }
 0x1a0   :  { %v280_v52 = vsub.f32 %v279_v50, %v274_v11 }
 0x1a1   :  { %v252_v36 = vadd.f32 %v251_v31, %v245_v30 }
 0x1a3   :  { %v259_v40 = vadd.f32 %v258_v38, %v252_v36 }
 0x1a5   :  { %v266_v43 = vadd.f32 %v265_v41, %v259_v40 }
 0x1a7   :  { %v273_v46 = vadd.f32 %v272_v44, %v266_v43 }
 0x1a9   :  { %480 = vlog2.f32 %v273_v46 }
 0x1b3   :  { %v481_v51 = vpop.eup %480 }
 0x1b4   :  { %v282_v53 = vmul.f32 0.6931472, %v481_v51 }
 0x1b6   :  { %v283_v54 = vadd.f32 %v282_v53, %v280_v52 }
 0x1b8   :  { %285 = vrot.lane.b32.xlu0 %v283_v54, %s501_s4 }
 0x1f3   :  { %v323_v58 = vpop.permute.xlu0 %322 }
 0x1f4   :  { %v325_v59 = vadd.f32 %v323_v58, %v320_v57 }
 0x1f6   :  { %482 = vlog2.f32 %v325_v59 }
 0x1f7   :  { %484 = vlog2.f32 %v576_v33 }
 0x200   :  { %v483_v60 = vpop.eup %482  ;;  %v307_v61 = vpop.permute.xlu0 %306 }
 0x201   :  { %v327_v62 = vmul.f32 0.6931472, %v483_v60  ;;  %v309_v45 = vmul.f32 %v307_v61, %v574_v32  ;;  %v343_v32 = vand.u32 2147483647, %v587_v37  ;;  %v485_v9 = vpop.eup %484 }
 0x202   :  { %v300_v10 = vmul.f32 0.6931472, %v485_v9 }
 0x203   :  { %329 = vrot.lane.b32.xlu1 %v327_v62, %s503_s18  ;;  %311 = vrot.lane.b32.xlu0 %v309_v45, %s501_s4 }
 0x204   :  { %v301_v11 = vsub.f32 1.1447299, %v300_v10 }
 0x206   :  { %v302_v13 = vmul.f32 0.5, %v301_v11 }
 0x207   :  { %350 = vrot.lane.b32.xlu1 %v348_v1, %s501_s4 }
 0x22a   :  { %v286_v2 = vpop.permute.xlu0 %285 }
 0x22b   :  { %v288_v3 = vsub.f32 %v283_v54, %v286_v2 }
 0x22d   :  { %339 = vrot.lane.b32.xlu0 %v288_v3, %s503_s18 }
 0x275   :  { %v330_v4 = vpop.permute.xlu1 %329  ;;  %v312_v12 = vpop.permute.xlu0 %311 }
 0x276   :  { %v332_v5 = vmul.f32 %v330_v4, %v579_v34  ;;  %v314_v14 = vsub.f32 %v302_v13, %v312_v12 }
 0x278   :  { %334 = vrot.lane.b32.xlu1 %v332_v5, %s501_s4 }
 0x279   :  { %v351_v6 = vpop.permute.xlu1 %350 }
 0x27a   :  { %v353_v7 = vmul.f32 %v351_v6, %v343_v32 }
 0x27c   :  { %v354_v8 = vmul.f32 0.01, %v353_v7 }
 0x27e   :  { %356 = vrot.lane.b32.xlu1 %v354_v8, %s503_s18 }
 0x29f   :  { %v340_v34 = vpop.permute.xlu0 %339 }
 0x2ea   :  { %v335_v15 = vpop.permute.xlu1 %334 }
 0x2eb   :  { %v337_v16 = vadd.f32 %v335_v15, %v314_v14 }
 0x2ed   :  { %v342_v17 = vadd.f32 %v340_v34, %v337_v16 }
 0x2f0   :  { %v357_v18 = vpop.permute.xlu1 %356 }
 0x2f1   :  { %v359_v19 = vadd.f32 %v357_v18, %v342_v17 }
 0x2f3   :  { %361 = vrot.lane.b32.xlu0 %v359_v19, %s501_s4 }
 0x365   :  { %v362_v37 = vpop.permute.xlu0 %361 }
 0x366   :  { %v364_v20 = vsel %vm215_vm2, %v362_v37, 0.0 }
 0x367   :  { %365 = vadd.xlane.f32.xlu1 %v364_v20 }
 0x3f4   :  { %v366_v21 = vpop.xlane.xlu1 %365 }
 0x3f5   :  { %v367_v33 = vrot.slane %v366_v21, 4 }
 0x3f7   :  { %v368_v22 = vadd.f32 %v367_v33, %v366_v21 }
 0x3f9   :  { %v369_v23 = vrot.slane %v368_v22, 2 }
 0x3fb   :  { %v370_v24 = vadd.f32 %v369_v23, %v368_v22 }
 0x3fd   :  { %v371_v25 = vrot.slane %v370_v24, 1 }
 0x3ff   :  { %v372_v26 = vadd.f32 %v371_v25, %v370_v24 }
 0x401   :  { %445 = vpush %v372_v26 }
 0x432   :  { %s446_s5 = spop %445 }
 0x433   :  { %s382_s20 = smul.f32 0.125, %s446_s5 }
 0x435   :  { %383 = sst [smem:[#allocation2]] %s382_s20 }
 0x436   :  { %495 = shalt.err (!%p492_p2)
}
 0x437   :  { %s505_s28 = smov [#allocation2]  }
 0x438   :  { %391 = dma.smem_to_hbm %s505_s28, 16, %s640_s6, [#allocation3]  }
 0x439   :  { %496 = dma.done.wait [#allocation3], 16  }
 0x43a   :  { %497 = vsyncadd [#allocation3], 4294967280 }
 0x43b   :  { %395 = sfence }
 0x43c   :  { %396 = vsyncpa [#allocation3], 1 }

</bundles_post_ra>
